<compile_context>
chip_gen: v6e
topology: v6e:2x2x1
jax: 0.10.0
libtpu: 0.0.40
codegen_flags: <defaults>
</compile_context>

<pallas_src>
import math
from functools import partial

import jax
import jax.numpy as jnp
from jax.experimental import pallas as pl
from jax.experimental.pallas import tpu as pltpu

_LN_EPS = 1e-5
_DISC_DIM = 1024


# ----------------------------- in-kernel helpers (pure jnp) -----------------------------

def _layernorm_f32(x, gamma, beta, eps):
    mean = jnp.mean(x, axis=-1, keepdims=True)
    var = jnp.mean(jnp.square(x - mean), axis=-1, keepdims=True)
    return (x - mean) * jax.lax.rsqrt(var + eps) * gamma + beta


def _softmax_rows(s):
    s = s - jnp.max(s, axis=-1, keepdims=True)
    e = jnp.exp(s)
    return e / jnp.sum(e, axis=-1, keepdims=True)     # exact division (review concern)


def _mlp_tail(x, g2, b2, wf, bf, wp, bp, eps):
    """LN2 -> c_fc -> QuickGELU -> c_proj -> +residual (all arrays already loaded)."""
    mxdt = wf.dtype
    h2 = _layernorm_f32(x, g2, b2, eps)
    m = jnp.dot(h2.astype(mxdt), wf, preferred_element_type=jnp.float32) + bf
    m = m * jax.nn.sigmoid(1.702 * m)                  # QuickGELU (f32 / EUP)
    y = jnp.dot(m.astype(mxdt), wp, preferred_element_type=jnp.float32) + bp
    return x + y


# ----------------------------------- Pallas kernels --------------------------------------

def _std_layer_kernel(x_ref, g1_ref, b1_ref, wqkv_ref, bqkv_ref, wo_ref, bo_ref,
                      g2_ref, b2_ref, wf_ref, bf_ref, wp_ref, bp_ref, o_ref,
                      *, nb, L, heads, eps, scale):
    """Fused standard layer: LN1 + MHA + residual + LN2 + MLP + residual on a batch chunk."""
    R, D = x_ref.shape                                  # R = nb * L
    Dh = D // heads
    mxdt = wqkv_ref.dtype

    x = x_ref[...].astype(jnp.float32)                  # (R, D)
    h = _layernorm_f32(x, g1_ref[...].astype(jnp.float32),
                       b1_ref[...].astype(jnp.float32), eps)

    # One QKV projection for the whole chunk (M = R).
    qkv = jnp.dot(h.astype(mxdt), wqkv_ref[...], preferred_element_type=jnp.float32)
    qkv = qkv + bqkv_ref[...].astype(jnp.float32)       # (R, 3D)

    # Per-(batch, head) L x L attention; contexts collected into one (R, D) buffer.
    ctx_rows = []
    for n in range(nb):
        r0 = n * L
        head_ctx = []
        for hh in range(heads):
            lo = hh * Dh
            q = qkv[r0:r0 + L, lo:lo + Dh].astype(mxdt)
            k = qkv[r0:r0 + L, D + lo:D + lo + Dh].astype(mxdt)
            v = qkv[r0:r0 + L, 2 * D + lo:2 * D + lo + Dh].astype(mxdt)
            s = jax.lax.dot_general(q, k, (((1,), (1,)), ((), ())),
                                    preferred_element_type=jnp.float32) * scale
            p = _softmax_rows(s)                         # (L, L) f32
            head_ctx.append(jnp.dot(p.astype(mxdt), v,
                                    preferred_element_type=jnp.float32))
        ctx_rows.append(jnp.concatenate(head_ctx, axis=1))        # (L, D)
    ctx = jnp.concatenate(ctx_rows, axis=0) if nb > 1 else ctx_rows[0]

    # Single out-projection (K = D) + residual.
    attn = jnp.dot(ctx.astype(mxdt), wo_ref[...], preferred_element_type=jnp.float32)
    x = x + attn + bo_ref[...].astype(jnp.float32)

    out = _mlp_tail(x,
                    g2_ref[...].astype(jnp.float32), b2_ref[...].astype(jnp.float32),
                    wf_ref[...], bf_ref[...].astype(jnp.float32),
                    wp_ref[...], bp_ref[...].astype(jnp.float32), eps)
    o_ref[...] = out.astype(o_ref.dtype)


def _adv_layer_kernel(x_ref, g1_ref, b1_ref, wqkv_ref, bqkv_ref, wo_ref, bo_ref,
                      aw1_ref, ab1_ref, aw2_ref, ab2_ref, aw3_ref, ab3_ref,
                      g2_ref, b2_ref, wf_ref, bf_ref, wp_ref, bp_ref, o_ref,
                      *, nb, L, heads, eps, scale, target_ones):
    """Fused last layer: LN1 + adversarial Attention (Discriminator+BCE logits) +
    residual + LN2 + MLP + residual on a batch chunk."""
    R, D = x_ref.shape
    Dh = D // heads
    mxdt = wqkv_ref.dtype

    x = x_ref[...].astype(jnp.float32)
    h = _layernorm_f32(x, g1_ref[...].astype(jnp.float32),
                       b1_ref[...].astype(jnp.float32), eps)

    # hidden_states.transpose(0,1) in the reference: our rows are already (batch, seq).
    qkv = jnp.dot(h.astype(mxdt), wqkv_ref[...], preferred_element_type=jnp.float32)
    qkv = qkv + bqkv_ref[...].astype(jnp.float32)        # [q | k | v], (R, 3D)

    # TODO(synk): `pre` is an external callable (e.g. gradient reversal) in the module;
    # it is identity in this forward pass.

    # ---- Discriminator hoisted out of the head loop: one pass, M = 2*heads*R. ----
    pieces = []
    for hh in range(heads):
        lo = hh * Dh
        pieces.append(qkv[:, lo:lo + Dh])                # q, head hh      (R, Dh)
    for hh in range(heads):
        lo = hh * Dh
        pieces.append(qkv[:, D + lo:D + lo + Dh])        # k, head hh      (R, Dh)
    disc_in = jnp.concatenate(pieces, axis=0)            # (2*heads*R, Dh) f32

    a = jnp.dot(disc_in.astype(mxdt), aw1_ref[...],
                preferred_element_type=jnp.float32) + ab1_ref[...].astype(jnp.float32)
    a = jnp.maximum(a, 0.0)
    a = jnp.dot(a.astype(mxdt), aw2_ref[...],
                preferred_element_type=jnp.float32) + ab2_ref[...].astype(jnp.float32)
    a = jnp.maximum(a, 0.0)
    # Final (DIM -> 1) layer as VPU multiply + lane reduction (no degenerate N=1 matmul).
    w3_row = aw3_ref[...].astype(jnp.float32)             # (1, DIM)
    logit = jnp.sum(a * w3_row, axis=-1, keepdims=True) + ab3_ref[...].astype(jnp.float32)

    # BCE(sigmoid(z), ones) = softplus(-z); BCE(sigmoid(z), zeros) = softplus(z).
    # torch.nn.BCELoss clamps the log term at -100 -> loss <= 100.
    z = -logit if target_ones else logit
    bce = jnp.maximum(z, 0.0) + jnp.log(1.0 + jnp.exp(-jnp.abs(z)))
    bce = jnp.minimum(bce, 100.0)                          # (2*heads*R, 1) f32

    # Small identity used to turn an (L,1) column into a (1,L) row via VPU+XLU
    # (avoids both a rank-1 MXU matmul and a lane<->sublane relayout).
    eye_L = (jax.lax.broadcasted_iota(jnp.int32, (L, L), 0)
             == jax.lax.broadcasted_iota(jnp.int32, (L, L), 1)).astype(jnp.float32)

    ctx_rows = []
    for n in range(nb):
        r0 = n * L
        head_ctx = []
        for hh in range(heads):
            qofs = hh * R + r0
            kofs = heads * R + hh * R + r0
            q1 = bce[qofs:qofs + L, :]                     # (L, 1)
            k1 = bce[kofs:kofs + L, :]                     # (L, 1)
            k1row = jnp.sum(k1 * eye_L, axis=0, keepdims=True)   # (1, L)
            s = q1 * k1row * scale                         # rank-1 outer product, VPU only
            p = _softmax_rows(s)
            v = qkv[r0:r0 + L, 2 * D + hh * Dh:2 * D + (hh + 1) * Dh].astype(mxdt)
            head_ctx.append(jnp.dot(p.astype(mxdt), v,
                                    preferred_element_type=jnp.float32))
        ctx_rows.append(jnp.concatenate(head_ctx, axis=1))
    ctx = jnp.concatenate(ctx_rows, axis=0) if nb > 1 else ctx_rows[0]

    attn = jnp.dot(ctx.astype(mxdt), wo_ref[...], preferred_element_type=jnp.float32)
    x = x + attn + bo_ref[...].astype(jnp.float32)

    out = _mlp_tail(x,
                    g2_ref[...].astype(jnp.float32), b2_ref[...].astype(jnp.float32),
                    wf_ref[...], bf_ref[...].astype(jnp.float32),
                    wp_ref[...], bp_ref[...].astype(jnp.float32), eps)
    o_ref[...] = out.astype(o_ref.dtype)


# --------------------------------- host-side wrappers -------------------------------------

def _pick_batch_block(N, L, target_rows=256):
    """Largest per-step batch chunk whose row count stays <= target, preferring grid >= 2."""
    cands = []
    for nbc in range(1, N + 1):
        if N % nbc:
            continue
        if (nbc * L) % 8 != 0 and nbc != N:      # (8,128) block constraint on row tiles
            continue
        cands.append(nbc)
    multi = [c for c in cands if N // c >= 2]
    pool = multi if multi else cands
    good = [c for c in pool if c * L <= target_rows]
    return max(good) if good else min(pool)


def _vmem_limit(weight_arrays, activation_bytes):
    wbytes = sum(int(a.size) * a.dtype.itemsize for a in weight_arrays)
    est = 2 * wbytes + int(activation_bytes) + (8 << 20)
    return int(min(max(est, 32 << 20), 56 << 20))       # stay under v7x 64 MiB physical


def _std_layer_call(xb, p, *, heads, N, L, nb):
    rows, D = xb.shape
    R = nb * L
    Dh = D // heads
    H3, H4 = 3 * D, p['fc_w'].shape[1]
    kern = partial(_std_layer_kernel, nb=nb, L=L, heads=heads, eps=_LN_EPS,
                   scale=1.0 / math.sqrt(Dh))
    weights = (p['in_proj_w'], p['out_w'], p['fc_w'], p['proj_w'])
    vmem = _vmem_limit(weights, 4 * R * (2 * D + H3 + H4) * 2)
    flops = 2 * rows * D * (3 * D + D + 2 * H4) + 4 * N * heads * L * L * Dh
    transc = N * heads * L * L + rows * H4
    bytes_acc = 2 * rows * D * 4 + sum(int(a.size) * a.dtype.itemsize for a in weights)

    return pl.pallas_call(
        kern,
        grid=(N // nb,),
        out_shape=jax.ShapeDtypeStruct((rows, D), xb.dtype),
        in_specs=[
            pl.BlockSpec((R, D), lambda i: (i, 0)),        # x (residual)
            pl.BlockSpec((1, D), lambda i: (0, 0)),        # ln1 gamma
            pl.BlockSpec((1, D), lambda i: (0, 0)),        # ln1 beta
            pl.BlockSpec((D, H3), lambda i: (0, 0)),       # in_proj W (bf16)
            pl.BlockSpec((1, H3), lambda i: (0, 0)),       # in_proj b
            pl.BlockSpec((D, D), lambda i: (0, 0)),        # out_proj W (bf16)
            pl.BlockSpec((1, D), lambda i: (0, 0)),        # out_proj b
            pl.BlockSpec((1, D), lambda i: (0, 0)),        # ln2 gamma
            pl.BlockSpec((1, D), lambda i: (0, 0)),        # ln2 beta
            pl.BlockSpec((D, H4), lambda i: (0, 0)),       # c_fc W (bf16)
            pl.BlockSpec((1, H4), lambda i: (0, 0)),       # c_fc b
            pl.BlockSpec((H4, D), lambda i: (0, 0)),       # c_proj W (bf16)
            pl.BlockSpec((1, D), lambda i: (0, 0)),        # c_proj b
        ],
        out_specs=pl.BlockSpec((R, D), lambda i: (i, 0)),
        compiler_params=pltpu.CompilerParams(
            dimension_semantics=("parallel",), vmem_limit_bytes=vmem),
        cost_estimate=pl.CostEstimate(flops=int(flops), transcendentals=int(transc),
                                      bytes_accessed=int(bytes_acc)),
    )(xb,
      p['ln1_g'].reshape(1, D), p['ln1_b'].reshape(1, D),
      p['in_proj_w'], p['in_proj_b'].reshape(1, H3),
      p['out_w'], p['out_b'].reshape(1, D),
      p['ln2_g'].reshape(1, D), p['ln2_b'].reshape(1, D),
      p['fc_w'], p['fc_b'].reshape(1, H4),
      p['proj_w'], p['proj_b'].reshape(1, D))


def _adv_layer_call(xb, p, *, heads, N, L, nb, is_source=None):
    rows, D = xb.shape
    R = nb * L
    Dh = D // heads
    H3, H4 = 3 * D, p['fc_w'].shape[1]
    DIM = p['ad_w2'].shape[0]
    # is_source falsy (incl. None) -> BCE vs ones, matching the reference `else` branch.
    kern = partial(_adv_layer_kernel, nb=nb, L=L, heads=heads, eps=_LN_EPS,
                   scale=1.0 / math.sqrt(Dh), target_ones=not bool(is_source))
    weights = (p['qkv_w'], p['out_w'], p['fc_w'], p['proj_w'],
               p['ad_w1'], p['ad_w2'], p['ad_w3r'])
    m2 = 2 * heads * R
    vmem = _vmem_limit(weights, 4 * (R * (2 * D + H3 + H4) + 2 * m2 * DIM) * 2)
    flops = (2 * rows * D * (3 * D + D + 2 * H4)
             + 2 * (2 * heads * rows) * (Dh * DIM + DIM * DIM + DIM)
             + 2 * N * heads * L * L * Dh)
    transc = 2 * heads * rows + N * heads * L * L + rows * H4
    bytes_acc = 2 * rows * D * 4 + sum(int(a.size) * a.dtype.itemsize for a in weights)

    return pl.pallas_call(
        kern,
        grid=(N // nb,),
        out_shape=jax.ShapeDtypeStruct((rows, D), xb.dtype),
        in_specs=[
            pl.BlockSpec((R, D), lambda i: (i, 0)),        # x
            pl.BlockSpec((1, D), lambda i: (0, 0)),        # ln1 gamma
            pl.BlockSpec((1, D), lambda i: (0, 0)),        # ln1 beta
            pl.BlockSpec((D, H3), lambda i: (0, 0)),       # [Wq|Wk|Wv] (bf16)
            pl.BlockSpec((1, H3), lambda i: (0, 0)),       # [bq|bk|bv]
            pl.BlockSpec((D, D), lambda i: (0, 0)),        # out W (bf16)
            pl.BlockSpec((1, D), lambda i: (0, 0)),        # out b
            pl.BlockSpec((Dh, DIM), lambda i: (0, 0)),     # disc W1 (bf16)
            pl.BlockSpec((1, DIM), lambda i: (0, 0)),      # disc b1
            pl.BlockSpec((DIM, DIM), lambda i: (0, 0)),    # disc W2 (bf16)
            pl.BlockSpec((1, DIM), lambda i: (0, 0)),      # disc b2
            pl.BlockSpec((1, DIM), lambda i: (0, 0)),      # disc W3 row (bf16)
            pl.BlockSpec((1, 1), lambda i: (0, 0)),        # disc b3
            pl.BlockSpec((1, D), lambda i: (0, 0)),        # ln2 gamma
            pl.BlockSpec((1, D), lambda i: (0, 0)),        # ln2 beta
            pl.BlockSpec((D, H4), lambda i: (0, 0)),       # c_fc W (bf16)
            pl.BlockSpec((1, H4), lambda i: (0, 0)),       # c_fc b
            pl.BlockSpec((H4, D), lambda i: (0, 0)),       # c_proj W (bf16)
            pl.BlockSpec((1, D), lambda i: (0, 0)),        # c_proj b
        ],
        out_specs=pl.BlockSpec((R, D), lambda i: (i, 0)),
        compiler_params=pltpu.CompilerParams(
            dimension_semantics=("parallel",), vmem_limit_bytes=vmem),
        cost_estimate=pl.CostEstimate(flops=int(flops), transcendentals=int(transc),
                                      bytes_accessed=int(bytes_acc)),
    )(xb,
      p['ln1_g'].reshape(1, D), p['ln1_b'].reshape(1, D),
      p['qkv_w'], p['qkv_b'].reshape(1, H3),
      p['out_w'], p['out_b'].reshape(1, D),
      p['ad_w1'], p['ad_b1'].reshape(1, DIM),
      p['ad_w2'], p['ad_b2'].reshape(1, DIM),
      p['ad_w3r'], p['ad_b3'].reshape(1, 1),
      p['ln2_g'].reshape(1, D), p['ln2_b'].reshape(1, D),
      p['fc_w'], p['fc_b'].reshape(1, H4),
      p['proj_w'], p['proj_b'].reshape(1, D))


def temporal_modelling_forward(x, params, heads, loss_ad=0, ad_net=None, is_source=None):
    """x: (L, N, D) in the PyTorch 'LND' layout. Returns (x, loss_ad, ad_net, is_source)."""
    L, N, D = x.shape
    xb = jnp.transpose(x, (1, 0, 2)).reshape(N * L, D)   # single transpose in, rows = (n, l)
    nb = _pick_batch_block(N, L)
    n_layers = len(params)
    for i, p in enumerate(params):
        if i == n_layers - 1:
            xb = _adv_layer_call(xb, p, heads=heads, N=N, L=L, nb=nb, is_source=is_source)
        else:
            xb = _std_layer_call(xb, p, heads=heads, N=N, L=L, nb=nb)
    out = jnp.transpose(xb.reshape(N, L, D), (1, 0, 2))   # single transpose out
    return out, loss_ad, ad_net, is_source


# ------------------------------------ parameter init --------------------------------------

def init_params(key, width, layers, heads):
    Dh = width // heads

    def nxt():
        nonlocal key
        key, sub = jax.random.split(key)
        return sub

    def lin(din, dout):
        # Stored transposed vs PyTorch (in, out); matmul weights kept in bf16.
        w = (jax.random.normal(nxt(), (din, dout), jnp.float32)
             / math.sqrt(din)).astype(jnp.bfloat16)
        b = jnp.zeros((dout,), jnp.float32)
        return w, b

    params = []
    for i in range(layers):
        p = {
            'ln1_g': jnp.ones((width,), jnp.float32),
            'ln1_b': jnp.zeros((width,), jnp.float32),
            'ln2_g': jnp.ones((width,), jnp.float32),
            'ln2_b': jnp.zeros((width,), jnp.float32),
        }
        p['fc_w'], p['fc_b'] = lin(width, 4 * width)
        p['proj_w'], p['proj_b'] = lin(4 * width, width)
        if i == layers - 1:
            # Separate q/k/v linears in the reference; concatenated host-side so the
            # kernel runs a single QKV matmul.
            qw, qb = lin(width, width)
            kw, kb = lin(width, width)
            vw, vb = lin(width, width)
            p['qkv_w'] = jnp.concatenate([qw, kw, vw], axis=1)
            p['qkv_b'] = jnp.concatenate([qb, kb, vb], axis=0)
            p['out_w'], p['out_b'] = lin(width, width)
            p['ad_w1'], p['ad_b1'] = lin(Dh, _DISC_DIM)
            p['ad_w2'], p['ad_b2'] = lin(_DISC_DIM, _DISC_DIM)
            w3, b3 = lin(_DISC_DIM, 1)
            p['ad_w3r'] = jnp.transpose(w3)               # (1, DIM) row for VPU mul+reduce
            p['ad_b3'] = b3                               # (1,)
        else:
            p['in_proj_w'], p['in_proj_b'] = lin(width, 3 * width)
            p['out_w'], p['out_b'] = lin(width, width)
        params.append(p)
    return params


# ------------------------------------------ main -------------------------------------------

if __name__ == "__main__":
    width, layers, heads = 64, 2, 4       # d_model=64, 2 blocks (last one is the custom Attention)
    L, N = 8, 2                           # seq=8, batch=2 (LND layout)

    key = jax.random.PRNGKey(0)
    kx, kp = jax.random.split(key)
    x = jax.random.normal(kx, (L, N, width), jnp.float32)
    params = init_params(kp, width, layers, heads)

    out, loss_ad, ad_net, is_source = temporal_modelling_forward(x, params, heads)
    out = jax.block_until_ready(out)

    assert out.shape == (L, N, width)
    assert bool(jnp.all(jnp.isfinite(out)))
    print("KERNEL_OK")
</pallas_src>

<mosaic_0001>
module attributes {stable_mosaic.version = 11 : i64} {
  func.func @_std_layer_kernel(%arg0: i32, %arg1: memref<8x64xf32, #tpu.memory_space<vmem>>, %arg2: memref<1x64xf32, #tpu.memory_space<vmem>>, %arg3: memref<1x64xf32, #tpu.memory_space<vmem>>, %arg4: memref<64x192xbf16, #tpu.memory_space<vmem>>, %arg5: memref<1x192xf32, #tpu.memory_space<vmem>>, %arg6: memref<64x64xbf16, #tpu.memory_space<vmem>>, %arg7: memref<1x64xf32, #tpu.memory_space<vmem>>, %arg8: memref<1x64xf32, #tpu.memory_space<vmem>>, %arg9: memref<1x64xf32, #tpu.memory_space<vmem>>, %arg10: memref<64x256xbf16, #tpu.memory_space<vmem>>, %arg11: memref<1x256xf32, #tpu.memory_space<vmem>>, %arg12: memref<256x64xbf16, #tpu.memory_space<vmem>>, %arg13: memref<1x64xf32, #tpu.memory_space<vmem>>, %arg14: memref<8x64xf32, #tpu.memory_space<vmem>>) attributes {dimension_semantics = [#tpu.dimension_semantics<parallel>], iteration_bounds = array<i64: 2>, scalar_prefetch = 0 : i64, scratch_operands = 0 : i64, tpu.core_type = #tpu.core_type<tc>, window_params = [{transform_indices = @transform_0, window_bounds = array<i64: 8, 64>}, {pipeline_mode = #tpu.pipeline_mode<synchronous>, transform_indices = @transform_1, window_bounds = array<i64: 1, 64>}, {pipeline_mode = #tpu.pipeline_mode<synchronous>, transform_indices = @transform_2, window_bounds = array<i64: 1, 64>}, {pipeline_mode = #tpu.pipeline_mode<synchronous>, transform_indices = @transform_3, window_bounds = array<i64: 64, 192>}, {pipeline_mode = #tpu.pipeline_mode<synchronous>, transform_indices = @transform_4, window_bounds = array<i64: 1, 192>}, {pipeline_mode = #tpu.pipeline_mode<synchronous>, transform_indices = @transform_5, window_bounds = array<i64: 64, 64>}, {pipeline_mode = #tpu.pipeline_mode<synchronous>, transform_indices = @transform_6, window_bounds = array<i64: 1, 64>}, {pipeline_mode = #tpu.pipeline_mode<synchronous>, transform_indices = @transform_7, window_bounds = array<i64: 1, 64>}, {pipeline_mode = #tpu.pipeline_mode<synchronous>, transform_indices = @transform_8, window_bounds = array<i64: 1, 64>}, {pipeline_mode = #tpu.pipeline_mode<synchronous>, transform_indices = @transform_9, window_bounds = array<i64: 64, 256>}, {pipeline_mode = #tpu.pipeline_mode<synchronous>, transform_indices = @transform_10, window_bounds = array<i64: 1, 256>}, {pipeline_mode = #tpu.pipeline_mode<synchronous>, transform_indices = @transform_11, window_bounds = array<i64: 256, 64>}, {pipeline_mode = #tpu.pipeline_mode<synchronous>, transform_indices = @transform_12, window_bounds = array<i64: 1, 64>}, {transform_indices = @transform_13, window_bounds = array<i64: 8, 64>}]} {
    %c0 = arith.constant 0 : index
    %c0_0 = arith.constant 0 : index
    %0 = vector.load %arg1[%c0, %c0_0] : memref<8x64xf32, #tpu.memory_space<vmem>>, vector<8x64xf32>
    %c0_1 = arith.constant 0 : index
    %c0_2 = arith.constant 0 : index
    %1 = vector.load %arg2[%c0_1, %c0_2] : memref<1x64xf32, #tpu.memory_space<vmem>>, vector<1x64xf32>
    %c0_3 = arith.constant 0 : index
    %c0_4 = arith.constant 0 : index
    %2 = vector.load %arg3[%c0_3, %c0_4] : memref<1x64xf32, #tpu.memory_space<vmem>>, vector<1x64xf32>
    %cst = arith.constant dense<0.000000e+00> : vector<8xf32>
    %3 = vector.multi_reduction <add>, %0, %cst [1] : vector<8x64xf32> to vector<8xf32>
    %4 = vector.shape_cast %3 : vector<8xf32> to vector<8x1xf32>
    %cst_5 = arith.constant 6.400000e+01 : f32
    %5 = vector.broadcast %cst_5 : f32 to vector<8x1xf32>
    %6 = arith.divf %4, %5 : vector<8x1xf32>
    %7 = vector.broadcast %6 : vector<8x1xf32> to vector<8x64xf32>
    %8 = arith.subf %0, %7 : vector<8x64xf32>
    %9 = arith.mulf %8, %8 : vector<8x64xf32>
    %cst_6 = arith.constant dense<0.000000e+00> : vector<8xf32>
    %10 = vector.multi_reduction <add>, %9, %cst_6 [1] : vector<8x64xf32> to vector<8xf32>
    %11 = vector.shape_cast %10 : vector<8xf32> to vector<8x1xf32>
    %cst_7 = arith.constant 6.400000e+01 : f32
    %12 = vector.broadcast %cst_7 : f32 to vector<8x1xf32>
    %13 = arith.divf %11, %12 : vector<8x1xf32>
    %14 = vector.broadcast %6 : vector<8x1xf32> to vector<8x64xf32>
    %15 = arith.subf %0, %14 : vector<8x64xf32>
    %cst_8 = arith.constant 9.99999974E-6 : f32
    %16 = vector.broadcast %cst_8 : f32 to vector<8x1xf32>
    %17 = arith.addf %13, %16 : vector<8x1xf32>
    %18 = math.rsqrt %17 : vector<8x1xf32>
    %19 = vector.broadcast %18 : vector<8x1xf32> to vector<8x64xf32>
    %20 = arith.mulf %15, %19 : vector<8x64xf32>
    %21 = vector.broadcast %1 : vector<1x64xf32> to vector<8x64xf32>
    %22 = arith.mulf %20, %21 : vector<8x64xf32>
    %23 = vector.broadcast %2 : vector<1x64xf32> to vector<8x64xf32>
    %24 = arith.addf %22, %23 : vector<8x64xf32>
    %25 = arith.truncf %24 : vector<8x64xf32> to vector<8x64xbf16>
    %c0_9 = arith.constant 0 : index
    %c0_10 = arith.constant 0 : index
    %26 = vector.load %arg4[%c0_9, %c0_10] : memref<64x192xbf16, #tpu.memory_space<vmem>>, vector<64x192xbf16>
    %cst_11 = arith.constant dense<0.000000e+00> : vector<8x192xf32>
    %27 = tpu.matmul %25, %26, %cst_11 {dimension_numbers = #tpu.dot_dimension_numbers<[1], [0], [0], [1], [0, 0, 1, 1], [], []>} : vector<8x64xbf16>, vector<64x192xbf16>, vector<8x192xf32> -> vector<8x192xf32>
    %c0_12 = arith.constant 0 : index
    %c0_13 = arith.constant 0 : index
    %28 = vector.load %arg5[%c0_12, %c0_13] : memref<1x192xf32, #tpu.memory_space<vmem>>, vector<1x192xf32>
    %29 = vector.broadcast %28 : vector<1x192xf32> to vector<8x192xf32>
    %30 = arith.addf %27, %29 : vector<8x192xf32>
    %31 = vector.extract_strided_slice %30 {offsets = [0, 0], sizes = [8, 16], strides = [1, 1]} : vector<8x192xf32> to vector<8x16xf32>
    %32 = arith.truncf %31 : vector<8x16xf32> to vector<8x16xbf16>
    %33 = vector.extract_strided_slice %30 {offsets = [0, 64], sizes = [8, 16], strides = [1, 1]} : vector<8x192xf32> to vector<8x16xf32>
    %34 = arith.truncf %33 : vector<8x16xf32> to vector<8x16xbf16>
    %35 = vector.extract_strided_slice %30 {offsets = [0, 128], sizes = [8, 16], strides = [1, 1]} : vector<8x192xf32> to vector<8x16xf32>
    %36 = arith.truncf %35 : vector<8x16xf32> to vector<8x16xbf16>
    %cst_14 = arith.constant dense<0.000000e+00> : vector<8x8xf32>
    %37 = tpu.matmul %32, %34, %cst_14 {dimension_numbers = #tpu.dot_dimension_numbers<[1], [1], [0], [0], [0, 0, 1, 0], [], []>} : vector<8x16xbf16>, vector<8x16xbf16>, vector<8x8xf32> -> vector<8x8xf32>
    %cst_15 = arith.constant 2.500000e-01 : f32
    %38 = vector.broadcast %cst_15 : f32 to vector<8x8xf32>
    %39 = arith.mulf %37, %38 : vector<8x8xf32>
    %cst_16 = arith.constant dense<0xFF800000> : vector<8xf32>
    %40 = vector.multi_reduction <maximumf>, %39, %cst_16 [1] : vector<8x8xf32> to vector<8xf32>
    %41 = vector.shape_cast %40 : vector<8xf32> to vector<8x1xf32>
    %42 = vector.broadcast %41 : vector<8x1xf32> to vector<8x8xf32>
    %43 = arith.subf %39, %42 : vector<8x8xf32>
    %44 = math.exp %43 : vector<8x8xf32>
    %cst_17 = arith.constant dense<0.000000e+00> : vector<8xf32>
    %45 = vector.multi_reduction <add>, %44, %cst_17 [1] : vector<8x8xf32> to vector<8xf32>
    %46 = vector.shape_cast %45 : vector<8xf32> to vector<8x1xf32>
    %47 = vector.broadcast %46 : vector<8x1xf32> to vector<8x8xf32>
    %48 = arith.divf %44, %47 : vector<8x8xf32>
    %49 = arith.truncf %48 : vector<8x8xf32> to vector<8x8xbf16>
    %cst_18 = arith.constant dense<0.000000e+00> : vector<8x16xf32>
    %50 = tpu.matmul %49, %36, %cst_18 {dimension_numbers = #tpu.dot_dimension_numbers<[1], [0], [0], [1], [0, 0, 1, 1], [], []>} : vector<8x8xbf16>, vector<8x16xbf16>, vector<8x16xf32> -> vector<8x16xf32>
    %51 = vector.extract_strided_slice %30 {offsets = [0, 16], sizes = [8, 16], strides = [1, 1]} : vector<8x192xf32> to vector<8x16xf32>
    %52 = arith.truncf %51 : vector<8x16xf32> to vector<8x16xbf16>
    %53 = vector.extract_strided_slice %30 {offsets = [0, 80], sizes = [8, 16], strides = [1, 1]} : vector<8x192xf32> to vector<8x16xf32>
    %54 = arith.truncf %53 : vector<8x16xf32> to vector<8x16xbf16>
    %55 = vector.extract_strided_slice %30 {offsets = [0, 144], sizes = [8, 16], strides = [1, 1]} : vector<8x192xf32> to vector<8x16xf32>
    %56 = arith.truncf %55 : vector<8x16xf32> to vector<8x16xbf16>
    %cst_19 = arith.constant dense<0.000000e+00> : vector<8x8xf32>
    %57 = tpu.matmul %52, %54, %cst_19 {dimension_numbers = #tpu.dot_dimension_numbers<[1], [1], [0], [0], [0, 0, 1, 0], [], []>} : vector<8x16xbf16>, vector<8x16xbf16>, vector<8x8xf32> -> vector<8x8xf32>
    %cst_20 = arith.constant 2.500000e-01 : f32
    %58 = vector.broadcast %cst_20 : f32 to vector<8x8xf32>
    %59 = arith.mulf %57, %58 : vector<8x8xf32>
    %cst_21 = arith.constant dense<0xFF800000> : vector<8xf32>
    %60 = vector.multi_reduction <maximumf>, %59, %cst_21 [1] : vector<8x8xf32> to vector<8xf32>
    %61 = vector.shape_cast %60 : vector<8xf32> to vector<8x1xf32>
    %62 = vector.broadcast %61 : vector<8x1xf32> to vector<8x8xf32>
    %63 = arith.subf %59, %62 : vector<8x8xf32>
    %64 = math.exp %63 : vector<8x8xf32>
    %cst_22 = arith.constant dense<0.000000e+00> : vector<8xf32>
    %65 = vector.multi_reduction <add>, %64, %cst_22 [1] : vector<8x8xf32> to vector<8xf32>
    %66 = vector.shape_cast %65 : vector<8xf32> to vector<8x1xf32>
    %67 = vector.broadcast %66 : vector<8x1xf32> to vector<8x8xf32>
    %68 = arith.divf %64, %67 : vector<8x8xf32>
    %69 = arith.truncf %68 : vector<8x8xf32> to vector<8x8xbf16>
    %cst_23 = arith.constant dense<0.000000e+00> : vector<8x16xf32>
    %70 = tpu.matmul %69, %56, %cst_23 {dimension_numbers = #tpu.dot_dimension_numbers<[1], [0], [0], [1], [0, 0, 1, 1], [], []>} : vector<8x8xbf16>, vector<8x16xbf16>, vector<8x16xf32> -> vector<8x16xf32>
    %71 = vector.extract_strided_slice %30 {offsets = [0, 32], sizes = [8, 16], strides = [1, 1]} : vector<8x192xf32> to vector<8x16xf32>
    %72 = arith.truncf %71 : vector<8x16xf32> to vector<8x16xbf16>
    %73 = vector.extract_strided_slice %30 {offsets = [0, 96], sizes = [8, 16], strides = [1, 1]} : vector<8x192xf32> to vector<8x16xf32>
    %74 = arith.truncf %73 : vector<8x16xf32> to vector<8x16xbf16>
    %75 = vector.extract_strided_slice %30 {offsets = [0, 160], sizes = [8, 16], strides = [1, 1]} : vector<8x192xf32> to vector<8x16xf32>
    %76 = arith.truncf %75 : vector<8x16xf32> to vector<8x16xbf16>
    %cst_24 = arith.constant dense<0.000000e+00> : vector<8x8xf32>
    %77 = tpu.matmul %72, %74, %cst_24 {dimension_numbers = #tpu.dot_dimension_numbers<[1], [1], [0], [0], [0, 0, 1, 0], [], []>} : vector<8x16xbf16>, vector<8x16xbf16>, vector<8x8xf32> -> vector<8x8xf32>
    %cst_25 = arith.constant 2.500000e-01 : f32
    %78 = vector.broadcast %cst_25 : f32 to vector<8x8xf32>
    %79 = arith.mulf %77, %78 : vector<8x8xf32>
    %cst_26 = arith.constant dense<0xFF800000> : vector<8xf32>
    %80 = vector.multi_reduction <maximumf>, %79, %cst_26 [1] : vector<8x8xf32> to vector<8xf32>
    %81 = vector.shape_cast %80 : vector<8xf32> to vector<8x1xf32>
    %82 = vector.broadcast %81 : vector<8x1xf32> to vector<8x8xf32>
    %83 = arith.subf %79, %82 : vector<8x8xf32>
    %84 = math.exp %83 : vector<8x8xf32>
    %cst_27 = arith.constant dense<0.000000e+00> : vector<8xf32>
    %85 = vector.multi_reduction <add>, %84, %cst_27 [1] : vector<8x8xf32> to vector<8xf32>
    %86 = vector.shape_cast %85 : vector<8xf32> to vector<8x1xf32>
    %87 = vector.broadcast %86 : vector<8x1xf32> to vector<8x8xf32>
    %88 = arith.divf %84, %87 : vector<8x8xf32>
    %89 = arith.truncf %88 : vector<8x8xf32> to vector<8x8xbf16>
    %cst_28 = arith.constant dense<0.000000e+00> : vector<8x16xf32>
    %90 = tpu.matmul %89, %76, %cst_28 {dimension_numbers = #tpu.dot_dimension_numbers<[1], [0], [0], [1], [0, 0, 1, 1], [], []>} : vector<8x8xbf16>, vector<8x16xbf16>, vector<8x16xf32> -> vector<8x16xf32>
    %91 = vector.extract_strided_slice %30 {offsets = [0, 48], sizes = [8, 16], strides = [1, 1]} : vector<8x192xf32> to vector<8x16xf32>
    %92 = arith.truncf %91 : vector<8x16xf32> to vector<8x16xbf16>
    %93 = vector.extract_strided_slice %30 {offsets = [0, 112], sizes = [8, 16], strides = [1, 1]} : vector<8x192xf32> to vector<8x16xf32>
    %94 = arith.truncf %93 : vector<8x16xf32> to vector<8x16xbf16>
    %95 = vector.extract_strided_slice %30 {offsets = [0, 176], sizes = [8, 16], strides = [1, 1]} : vector<8x192xf32> to vector<8x16xf32>
    %96 = arith.truncf %95 : vector<8x16xf32> to vector<8x16xbf16>
    %cst_29 = arith.constant dense<0.000000e+00> : vector<8x8xf32>
    %97 = tpu.matmul %92, %94, %cst_29 {dimension_numbers = #tpu.dot_dimension_numbers<[1], [1], [0], [0], [0, 0, 1, 0], [], []>} : vector<8x16xbf16>, vector<8x16xbf16>, vector<8x8xf32> -> vector<8x8xf32>
    %cst_30 = arith.constant 2.500000e-01 : f32
    %98 = vector.broadcast %cst_30 : f32 to vector<8x8xf32>
    %99 = arith.mulf %97, %98 : vector<8x8xf32>
    %cst_31 = arith.constant dense<0xFF800000> : vector<8xf32>
    %100 = vector.multi_reduction <maximumf>, %99, %cst_31 [1] : vector<8x8xf32> to vector<8xf32>
    %101 = vector.shape_cast %100 : vector<8xf32> to vector<8x1xf32>
    %102 = vector.broadcast %101 : vector<8x1xf32> to vector<8x8xf32>
    %103 = arith.subf %99, %102 : vector<8x8xf32>
    %104 = math.exp %103 : vector<8x8xf32>
    %cst_32 = arith.constant dense<0.000000e+00> : vector<8xf32>
    %105 = vector.multi_reduction <add>, %104, %cst_32 [1] : vector<8x8xf32> to vector<8xf32>
    %106 = vector.shape_cast %105 : vector<8xf32> to vector<8x1xf32>
    %107 = vector.broadcast %106 : vector<8x1xf32> to vector<8x8xf32>
    %108 = arith.divf %104, %107 : vector<8x8xf32>
    %109 = arith.truncf %108 : vector<8x8xf32> to vector<8x8xbf16>
    %cst_33 = arith.constant dense<0.000000e+00> : vector<8x16xf32>
    %110 = tpu.matmul %109, %96, %cst_33 {dimension_numbers = #tpu.dot_dimension_numbers<[1], [0], [0], [1], [0, 0, 1, 1], [], []>} : vector<8x8xbf16>, vector<8x16xbf16>, vector<8x16xf32> -> vector<8x16xf32>
    %111 = tpu.concatenate %50, %70, %90, %110 in 1 : vector<8x16xf32>, vector<8x16xf32>, vector<8x16xf32>, vector<8x16xf32> -> vector<8x64xf32>
    %112 = arith.truncf %111 : vector<8x64xf32> to vector<8x64xbf16>
    %c0_34 = arith.constant 0 : index
    %c0_35 = arith.constant 0 : index
    %113 = vector.load %arg6[%c0_34, %c0_35] : memref<64x64xbf16, #tpu.memory_space<vmem>>, vector<64x64xbf16>
    %cst_36 = arith.constant dense<0.000000e+00> : vector<8x64xf32>
    %114 = tpu.matmul %112, %113, %cst_36 {dimension_numbers = #tpu.dot_dimension_numbers<[1], [0], [0], [1], [0, 0, 1, 1], [], []>} : vector<8x64xbf16>, vector<64x64xbf16>, vector<8x64xf32> -> vector<8x64xf32>
    %115 = arith.addf %0, %114 : vector<8x64xf32>
    %c0_37 = arith.constant 0 : index
    %c0_38 = arith.constant 0 : index
    %116 = vector.load %arg7[%c0_37, %c0_38] : memref<1x64xf32, #tpu.memory_space<vmem>>, vector<1x64xf32>
    %117 = vector.broadcast %116 : vector<1x64xf32> to vector<8x64xf32>
    %118 = arith.addf %115, %117 : vector<8x64xf32>
    %c0_39 = arith.constant 0 : index
    %c0_40 = arith.constant 0 : index
    %119 = vector.load %arg8[%c0_39, %c0_40] : memref<1x64xf32, #tpu.memory_space<vmem>>, vector<1x64xf32>
    %c0_41 = arith.constant 0 : index
    %c0_42 = arith.constant 0 : index
    %120 = vector.load %arg9[%c0_41, %c0_42] : memref<1x64xf32, #tpu.memory_space<vmem>>, vector<1x64xf32>
    %c0_43 = arith.constant 0 : index
    %c0_44 = arith.constant 0 : index
    %121 = vector.load %arg10[%c0_43, %c0_44] : memref<64x256xbf16, #tpu.memory_space<vmem>>, vector<64x256xbf16>
    %c0_45 = arith.constant 0 : index
    %c0_46 = arith.constant 0 : index
    %122 = vector.load %arg11[%c0_45, %c0_46] : memref<1x256xf32, #tpu.memory_space<vmem>>, vector<1x256xf32>
    %c0_47 = arith.constant 0 : index
    %c0_48 = arith.constant 0 : index
    %123 = vector.load %arg12[%c0_47, %c0_48] : memref<256x64xbf16, #tpu.memory_space<vmem>>, vector<256x64xbf16>
    %c0_49 = arith.constant 0 : index
    %c0_50 = arith.constant 0 : index
    %124 = vector.load %arg13[%c0_49, %c0_50] : memref<1x64xf32, #tpu.memory_space<vmem>>, vector<1x64xf32>
    %cst_51 = arith.constant dense<0.000000e+00> : vector<8xf32>
    %125 = vector.multi_reduction <add>, %118, %cst_51 [1] : vector<8x64xf32> to vector<8xf32>
    %126 = vector.shape_cast %125 : vector<8xf32> to vector<8x1xf32>
    %cst_52 = arith.constant 6.400000e+01 : f32
    %127 = vector.broadcast %cst_52 : f32 to vector<8x1xf32>
    %128 = arith.divf %126, %127 : vector<8x1xf32>
    %129 = vector.broadcast %128 : vector<8x1xf32> to vector<8x64xf32>
    %130 = arith.subf %118, %129 : vector<8x64xf32>
    %131 = arith.mulf %130, %130 : vector<8x64xf32>
    %cst_53 = arith.constant dense<0.000000e+00> : vector<8xf32>
    %132 = vector.multi_reduction <add>, %131, %cst_53 [1] : vector<8x64xf32> to vector<8xf32>
    %133 = vector.shape_cast %132 : vector<8xf32> to vector<8x1xf32>
    %cst_54 = arith.constant 6.400000e+01 : f32
    %134 = vector.broadcast %cst_54 : f32 to vector<8x1xf32>
    %135 = arith.divf %133, %134 : vector<8x1xf32>
    %136 = vector.broadcast %128 : vector<8x1xf32> to vector<8x64xf32>
    %137 = arith.subf %118, %136 : vector<8x64xf32>
    %cst_55 = arith.constant 9.99999974E-6 : f32
    %138 = vector.broadcast %cst_55 : f32 to vector<8x1xf32>
    %139 = arith.addf %135, %138 : vector<8x1xf32>
    %140 = math.rsqrt %139 : vector<8x1xf32>
    %141 = vector.broadcast %140 : vector<8x1xf32> to vector<8x64xf32>
    %142 = arith.mulf %137, %141 : vector<8x64xf32>
    %143 = vector.broadcast %119 : vector<1x64xf32> to vector<8x64xf32>
    %144 = arith.mulf %142, %143 : vector<8x64xf32>
    %145 = vector.broadcast %120 : vector<1x64xf32> to vector<8x64xf32>
    %146 = arith.addf %144, %145 : vector<8x64xf32>
    %147 = arith.truncf %146 : vector<8x64xf32> to vector<8x64xbf16>
    %cst_56 = arith.constant dense<0.000000e+00> : vector<8x256xf32>
    %148 = tpu.matmul %147, %121, %cst_56 {dimension_numbers = #tpu.dot_dimension_numbers<[1], [0], [0], [1], [0, 0, 1, 1], [], []>} : vector<8x64xbf16>, vector<64x256xbf16>, vector<8x256xf32> -> vector<8x256xf32>
    %149 = vector.broadcast %122 : vector<1x256xf32> to vector<8x256xf32>
    %150 = arith.addf %148, %149 : vector<8x256xf32>
    %cst_57 = arith.constant 1.702000e+00 : f32
    %151 = vector.broadcast %cst_57 : f32 to vector<8x256xf32>
    %152 = arith.mulf %151, %150 : vector<8x256xf32>
    %153 = arith.negf %152 : vector<8x256xf32>
    %154 = math.exp %153 : vector<8x256xf32>
    %cst_58 = arith.constant 1.000000e+00 : f32
    %155 = vector.broadcast %cst_58 : f32 to vector<8x256xf32>
    %156 = arith.addf %155, %154 : vector<8x256xf32>
    %157 = arith.divf %155, %156 : vector<8x256xf32>
    %158 = arith.mulf %150, %157 : vector<8x256xf32>
    %159 = arith.truncf %158 : vector<8x256xf32> to vector<8x256xbf16>
    %cst_59 = arith.constant dense<0.000000e+00> : vector<8x64xf32>
    %160 = tpu.matmul %159, %123, %cst_59 {dimension_numbers = #tpu.dot_dimension_numbers<[1], [0], [0], [1], [0, 0, 1, 1], [], []>} : vector<8x256xbf16>, vector<256x64xbf16>, vector<8x64xf32> -> vector<8x64xf32>
    %161 = vector.broadcast %124 : vector<1x64xf32> to vector<8x64xf32>
    %162 = arith.addf %160, %161 : vector<8x64xf32>
    %163 = arith.addf %118, %162 : vector<8x64xf32>
    %c0_60 = arith.constant 0 : index
    %c0_61 = arith.constant 0 : index
    %164 = vector.load %arg14[%c0_60, %c0_61] : memref<8x64xf32, #tpu.memory_space<vmem>>, vector<8x64xf32>
    tpu.vector_store %arg14[%c0_60, %c0_61], %163 {strides = array<i32>} : memref<8x64xf32, #tpu.memory_space<vmem>>, vector<8x64xf32>,
    return
  }
  func.func @transform_0(%arg0: i32) -> (i32, i32) {
    %c0_i32 = arith.constant 0 : i32
    %c0_i32_0 = arith.constant 0 : i32
    return %arg0, %c0_i32 : i32, i32
  }
  func.func @transform_1(%arg0: i32) -> (i32, i32) {
    %c0_i32 = arith.constant 0 : i32
    %c0_i32_0 = arith.constant 0 : i32
    %c0_i32_1 = arith.constant 0 : i32
    return %c0_i32, %c0_i32_0 : i32, i32
  }
  func.func @transform_2(%arg0: i32) -> (i32, i32) {
    %c0_i32 = arith.constant 0 : i32
    %c0_i32_0 = arith.constant 0 : i32
    %c0_i32_1 = arith.constant 0 : i32
    return %c0_i32, %c0_i32_0 : i32, i32
  }
  func.func @transform_3(%arg0: i32) -> (i32, i32) {
    %c0_i32 = arith.constant 0 : i32
    %c0_i32_0 = arith.constant 0 : i32
    %c0_i32_1 = arith.constant 0 : i32
    return %c0_i32, %c0_i32_0 : i32, i32
  }
  func.func @transform_4(%arg0: i32) -> (i32, i32) {
    %c0_i32 = arith.constant 0 : i32
    %c0_i32_0 = arith.constant 0 : i32
    %c0_i32_1 = arith.constant 0 : i32
    return %c0_i32, %c0_i32_0 : i32, i32
  }
  func.func @transform_5(%arg0: i32) -> (i32, i32) {
    %c0_i32 = arith.constant 0 : i32
    %c0_i32_0 = arith.constant 0 : i32
    %c0_i32_1 = arith.constant 0 : i32
    return %c0_i32, %c0_i32_0 : i32, i32
  }
  func.func @transform_6(%arg0: i32) -> (i32, i32) {
    %c0_i32 = arith.constant 0 : i32
    %c0_i32_0 = arith.constant 0 : i32
    %c0_i32_1 = arith.constant 0 : i32
    return %c0_i32, %c0_i32_0 : i32, i32
  }
  func.func @transform_7(%arg0: i32) -> (i32, i32) {
    %c0_i32 = arith.constant 0 : i32
    %c0_i32_0 = arith.constant 0 : i32
    %c0_i32_1 = arith.constant 0 : i32
    return %c0_i32, %c0_i32_0 : i32, i32
  }
  func.func @transform_8(%arg0: i32) -> (i32, i32) {
    %c0_i32 = arith.constant 0 : i32
    %c0_i32_0 = arith.constant 0 : i32
    %c0_i32_1 = arith.constant 0 : i32
    return %c0_i32, %c0_i32_0 : i32, i32
  }
  func.func @transform_9(%arg0: i32) -> (i32, i32) {
    %c0_i32 = arith.constant 0 : i32
    %c0_i32_0 = arith.constant 0 : i32
    %c0_i32_1 = arith.constant 0 : i32
    return %c0_i32, %c0_i32_0 : i32, i32
  }
  func.func @transform_10(%arg0: i32) -> (i32, i32) {
    %c0_i32 = arith.constant 0 : i32
    %c0_i32_0 = arith.constant 0 : i32
    %c0_i32_1 = arith.constant 0 : i32
    return %c0_i32, %c0_i32_0 : i32, i32
  }
  func.func @transform_11(%arg0: i32) -> (i32, i32) {
    %c0_i32 = arith.constant 0 : i32
    %c0_i32_0 = arith.constant 0 : i32
    %c0_i32_1 = arith.constant 0 : i32
    return %c0_i32, %c0_i32_0 : i32, i32
  }
  func.func @transform_12(%arg0: i32) -> (i32, i32) {
    %c0_i32 = arith.constant 0 : i32
    %c0_i32_0 = arith.constant 0 : i32
    %c0_i32_1 = arith.constant 0 : i32
    return %c0_i32, %c0_i32_0 : i32, i32
  }
  func.func @transform_13(%arg0: i32) -> (i32, i32) {
    %c0_i32 = arith.constant 0 : i32
    %c0_i32_0 = arith.constant 0 : i32
    return %arg0, %c0_i32 : i32, i32
  }
}

</mosaic_0001>

<bundles_post_ra>
// kernel: tpu_custom_call.1
= control target key start
LH: loop header
LB: loop body
LE: loop exit
PB: predicated region body
PF: predicated region fallthrough
CT: control target
= control target key end

     0   :  { %s2281_s0 = inlined_call_operand.vmem [shape: f32[16,64], index: 0, kind: input, shape index: {}]   ;;  %s2282_s1 = inlined_call_operand.vmem [shape: f32[1,64], index: 1, kind: input, shape index: {}]   ;;  %s2283_s2 = inlined_call_operand.vmem [shape: f32[1,64], index: 2, kind: input, shape index: {}]   ;;  %s2284_s3 = inlined_call_operand.vmem [shape: bf16[64,192], index: 3, kind: input, shape index: {}]   ;;  %s2285_s4 = inlined_call_operand.vmem [shape: f32[1,192], index: 4, kind: input, shape index: {}]   ;;  %s2286_s5 = inlined_call_operand.vmem [shape: bf16[64,64], index: 5, kind: input, shape index: {}]   ;;  %s2287_s6 = inlined_call_operand.vmem [shape: f32[1,64], index: 6, kind: input, shape index: {}]   ;;  %s2288_s7 = inlined_call_operand.vmem [shape: f32[1,64], index: 7, kind: input, shape index: {}]   ;;  %s2289_s8 = inlined_call_operand.vmem [shape: f32[1,64], index: 8, kind: input, shape index: {}]   ;;  %s2290_s9 = inlined_call_operand.vmem [shape: bf16[64,256], index: 9, kind: input, shape index: {}]   ;;  %s2291_s10 = inlined_call_operand.vmem [shape: f32[1,256], index: 10, kind: input, shape index: {}]   ;;  %s2292_s11 = inlined_call_operand.vmem [shape: bf16[256,64], index: 11, kind: input, shape index: {}]   ;;  %s2293_s12 = inlined_call_operand.vmem [shape: f32[1,64], index: 12, kind: input, shape index: {}]   ;;  %s2294_s13 = inlined_call_operand.hbm [shape: f32[16,64], index: 13, kind: output, shape index: {}]  }
   0x1   :  { %2296 = sst [smem:[#allocation5_spill]] %s2281_s0 }
   0x2   :  { %2297 = sst [smem:[#allocation6_spill]] %s2282_s1 }
   0x3   :  { %2298 = sst [smem:[#allocation7_spill]] %s2283_s2 }
   0x4   :  { %2299 = sst [smem:[#allocation8_spill]] %s2284_s3 }
   0x5   :  { %18 = vsyncpa [#allocation3], 0 }
   0x6   :  { %20 = vsyncpa [#allocation3 + $0x1], 0  ;;  %s1957_s25 = smov 0   ;;  %s1959_s26 = smov 0  }
   0x7   :  { %s1961_s27 = smov 0   ;;  %s1963_s28 = smov 0  }
   0x8 LB: > { %s1978_s29 = sadd.s32 4294967295, %s1874_s28   ;;  %s1525_s30 = sadd.s32 4294967294, %s1874_s28   ;;  %s1874_s28 = sphi %s1963_s28, %s2310_s28   ;;  %s1870_s27 = sphi %s1961_s27, %s2309_s27   ;;  %s1866_s26 = sphi %s1959_s26, %s2308_s26   ;;  %s1862_s25 = sphi %s1957_s25, %s2307_s25  }
   0x9   : > { %s1982_s14 = sadd.s32 1, %s1874_s28   ;;  %s311_s15 = sadd.s32 1, %s1870_s27 }
   0xa   : > { %s308_s16 = ssub.s32 %s1874_s28, %s1982_s14  ;;  %p321_p0 = scmp.ne.s32.totalorder %s1870_s27, %s1866_s26 }
   0xb   : > { %p309_p1 = scmp.eq.s32.totalorder %s308_s16, 0  ;;  %p322_p2 = scmp.eq.s32.totalorder %s1978_s29, 1 }
   0xc   : > { %p327_p3 = scmp.ne.s32.totalorder %s1866_s26, %s1862_s25  ;;  %p328_p4 = scmp.eq.s32.totalorder %s1525_s30, 1 }
   0xd   : > { %s1993_s17 = scalar_select %p309_p1, %s1870_s27, %s311_s15  }
   0xe   : > { %p1995_p5 = por %p322_p2, %p321_p0  ;;  %p1999_p6 = por %p328_p4, %p327_p3 }
   0xf   : > { %p1528_p7 = scmp.ge.s32.totalorder %s1874_s28, 1  ;;  %p389_p8 = scmp.lt.s32.totalorder %s1874_s28, 3 }
  0x11   : > { %p390_p9 = pnand %p1528_p7, %p389_p8 }
  0x12   : > { %p432_p10 = scmp.lt.s32.totalorder (!%p390_p9), %s1978_s29, 1  ;;  %s2302_s0 = sld [smem:[#allocation5_spill]] (!%p390_p9) }
  0x13   : > { %393 = sbr.rel (%p390_p9) target bundleno = 2497 (0x9c1), region = 72  ;;  %s2303_s3 = sld [smem:[#allocation8_spill]] (!%p390_p9) }
  0x14   : > { %s2304_s1 = sld [smem:[#allocation6_spill]] (!%p390_p9)  ;;  %s1879_s23 = smov (!%p390_p9), 112  }
  0x15   : > { %s2305_s2 = sld [smem:[#allocation7_spill]] (!%p390_p9)  ;;  %s2295_s30 = smov (!%p390_p9), 48  }
  0x16   : > { %s1882_s15 = smov (!%p390_p9), 32   ;;  %s1883_s16 = smov (!%p390_p9), 96  }
  0x18   : > { %s433_s20 = scalar_select %p432_p10, %s1978_s29, 1  ;;  %vm440_vm0 = vcmask 523264   ;;  %v1876_v11 = vmov 0   ;;  %v480_v26 = vlaneseq  ;;  %v1877_v28 = vmov 0.0   ;;  %v478_v30 = vld [vmem:[%s2285_s4] sm:$0x3] }
  0x19   : > { %v1742_v7 = vld [vmem:[%s2303_s3 + $0x34] ss:$8 sps:$4 sm:$0xff]   ;;  %v1744_v8 = vld [vmem:[%s2303_s3 + $0x30] ss:$8 sps:$4 sm:$0xff]   ;;  %v1745_v9 = vld [vmem:[%s2303_s3 + $0x24] ss:$8 sps:$4 sm:$0xff]   ;;  %565 = vmatprep.mubr.bf16.mxu1 %v1876_v11  ;;  %1645 = vmatprep.subr.bf16.mxu0 %v1877_v28 }
  0x1a   : > { %s1530_s21 = sshll.u32 %s433_s20, 3  ;;  %541 = vmatprep.subr.bf16.mxu1 %v1742_v7  ;;  %v1747_v10 = vld [vmem:[%s2303_s3 + $0x20] ss:$8 sps:$4 sm:$0xff]   ;;  %v1748_v12 = vld [vmem:[%s2303_s3 + $0x14] ss:$8 sps:$4 sm:$0xff]   ;;  %v2048_v27 = vshrl.u32 %v480_v26, 7 }
  0x1b   : > { %s435_s24 = scalar_lea.vmem %s2302_s0, %s1530_s21  ;;  %542 = vmatpush1.bf16.msra.mxu1 %v1744_v8  ;;  %v1750_v13 = vld [vmem:[%s2303_s3 + $0x10] ss:$8 sps:$4 sm:$0xff]   ;;  %v1751_v14 = vld [vmem:[%s2303_s3 + $0x4] ss:$8 sps:$4 sm:$0xff]   ;;  %v1753_v15 = vld [vmem:[%s2303_s3] ss:$8 sps:$4 sm:$0xff]  }
  0x1c   : > { %v2010_v0 = vld [vmem:[%s435_s24] sm:$0xff]  ;;  %543 = vmatprep.subr.bf16.mxu1 %v1745_v9  ;;  %v482_v29 = vsub.s32 0, %v2048_v27  ;;  %vm1878_vm1 = vmmov 0   ;;  %s1880_s24 = smov 64   ;;  %s1884_s20 = smov 16   ;;  %v486_v38 = vsub.s32 1, %v2048_v27 }
  0x1d   : > { %v441_v1 = vsel %vm440_vm0, %v2010_v0, 0.0  ;;  %v1531_v20 = vld [vmem:[%s2304_s1] ss:$0 sm:$0xff]  ;;  %1647 = vmatprep.mubr.msk.bf16.mxu0 %vm1878_vm1, %v1877_v28  ;;  %s1885_s21 = smov 80   ;;  %vm579_vm2 = vcmask 130048   ;;  %vm643_vm3 = vcmask 1043456  }
  0x1e   : > { %442 = vadd.xlane.f32.xlu0 %v441_v1  ;;  %v1532_v22 = vld [vmem:[%s2305_s2] ss:$0 sm:$0xff]  ;;  %v483_v31 = vrot.slane %v478_v30, %v482_v29  ;;  %v487_v39 = vrot.slane %v478_v30, %v486_v38  ;;  %vm627_vm4 = vcmask 64512   ;;  %vm1034_vm5 = vcmask 261120  }
  0x1f   : > { %544 = vmatpush1.bf16.msra.mxu1 %v1747_v10  ;;  %vm1036_vm6 = vcmask 392192  }
  0x20   : > { %545 = vmatprep.subr.bf16.mxu1 %v1748_v12 }
  0x23   : > { %546 = vmatpush1.bf16.msra.mxu1 %v1750_v13 }
  0x24   : > { %547 = vmatprep.subr.bf16.mxu1 %v1751_v14 }
  0x27   : > { %548 = vmatpush1.bf16.msra.mxu1 %v1753_v15 }
  0x28   : > { %1633 = vmatprep.subr.bf16.mxu1 %v1877_v28 }
  0xa7   : > { %v443_v2 = vpop.xlane.xlu0 %442 }
  0xa8   : > { %v445_v3 = vmul.f32 0.015625, %v443_v2 }
  0xaa   : > { %v446_v4 = vsub.f32 %v2010_v0, %v445_v3 }
  0xac   : > { %v447_v5 = vmul.f32 %v446_v4, %v446_v4 }
  0xae   : > { %v448_v6 = vsel %vm440_vm0, %v447_v5, 0.0 }
  0xaf   : > { %449 = vadd.xlane.f32.xlu0 %v448_v6 }
 0x138   : > { %v450_v16 = vpop.xlane.xlu0 %449 }
 0x139   : > { %v451_v17 = vmul.f32 0.015625, %v450_v16 }
 0x13b   : > { %v452_v18 = vadd.f32 1e-05, %v451_v17 }
 0x13d   : > { %1786 = vrsqrt.f32 %v452_v18 }
 0x14a   : > { %v1787_v19 = vpop.eup %1786 }
 0x14b   : > { %v454_v21 = vmul.f32 %v1787_v19, %v446_v4 }
 0x14d   : > { %v461_v23 = vmul.f32 %v1531_v20, %v454_v21 }
 0x14f   : > { %v468_v24 = vadd.f32 %v1532_v22, %v461_v23 }
 0x151   : > { %v469_v25 = vpack.c.bf16 %v468_v24, %v468_v24 }
 0x153   : > { %1541 = vmatmul.mubr.msk.bf16.vlgmr.msra.gmra.mxu1 %vm440_vm0, %v469_v25 }
 0x154   : > { %1635 = vmatprep.mubr.msk.bf16.mxu1 %vm1878_vm1, %v1877_v28 }
 0x213   : > { %v567_v32 = vpop.f32.mrf.mxu1 }
 0x214   : > { %v568_v33 = vadd.f32 %v567_v32, %v483_v31 }
 0x215   : > { %v569_v34 = vpop.f32.mrf.mxu1 }
 0x216   : > { %v574_v35 = vpack.c.bf16 %v568_v33, %v568_v33  ;;  %v570_v41 = vadd.f32 %v569_v34, %v487_v39 }
 0x217   : > { %v571_v36 = vpop.f32.mrf.mxu1 }
 0x218   : > { %687 = vrot.lane.b32.xlu0 %v574_v35, %s1879_s23  ;;  %577 = vrot.lane.b32.xlu1 %v574_v35, %s1880_s24  ;;  %v2073_v44 = vpack.c.bf16 %v570_v41, %v570_v41 }
 0x219   : > { %v572_v37 = vpop.f32.mrf.mxu1 }
 0x21a   : > { %v645_v47 = vsel %vm643_vm3, %v2073_v44, 0 }
 0x21c   : > { %689 = vrot.lane.b32.xlu1 %v574_v35, %s2295_s30  ;;  %s1587_s30 = sshll.u32 %s1978_s29, 7  ;;  %s1886_s29 = smov [#allocation2]  }
 0x21d   : > { %s1464_s22 = scalar_lea.hbm %s2294_s13, %s1587_s30 }
 0x220   : > { %801 = vrot.lane.b32.xlu1 %v574_v35, %s1882_s15 }
 0x224   : > { %799 = vrot.lane.b32.xlu1 %v574_v35, %s1883_s16 }
 0x228   : > { %912 = vrot.lane.b32.xlu1 %v574_v35, %s1884_s20 }
 0x22c   : > { %910 = vrot.lane.b32.xlu1 %v574_v35, %s1885_s21 }
 0x28a   : > { %v578_v40 = vpop.permute.xlu1 %577  ;;  %v688_v48 = vpop.permute.xlu0 %687 }
 0x28b   : > { %v584_v42 = vsel %vm579_vm2, %v578_v40, 0 }
 0x28c   : > { %1634 = vmatpush3.bf16.xpose.msra.mxu1 %v584_v42 }
 0x28d   : > { %1639 = vmatprep.subr.bf16.mxu1 %v1877_v28 }
 0x28e   : > { %v690_v43 = vpop.permute.xlu1 %689 }
 0x28f   : > { %v695_v45 = vsel %vm579_vm2, %v690_v43, 0 }
 0x290   : > { %1646 = vmatpush3.bf16.xpose.msra.mxu0 %v695_v45 }
 0x291   : > { %1657 = vmatprep.subr.bf16.mxu0 %v1877_v28 }
 0x292   : > { %v802_v46 = vpop.permute.xlu1 %801 }
 0x293   : > { %1636 = vmatmul.mubr.msk.bf16.vlgmr.msra.gmra.mxu1 %vm579_vm2, %v574_v35  ;;  %v807_v50 = vsel %vm579_vm2, %v802_v46, 0 }
 0x294   : > { %1640 = vmatpush3.bf16.msra.mxu1 %v645_v47  ;;  %1641 = vmatprep.mubr.msk.bf16.mxu1 %vm1878_vm1, %v1877_v28 }
 0x295   : > { %1651 = vmatprep.subr.bf16.mxu1 %v1877_v28 }
 0x296   : > { %v800_v49 = vpop.permute.xlu1 %799 }
 0x297   : > { %1648 = vmatmul.mubr.msk.bf16.vlgmr.msra.gmra.mxu0 %vm579_vm2, %v688_v48 }
 0x298   : > { %1658 = vmatpush3.bf16.xpose.msra.mxu0 %v807_v50  ;;  %1659 = vmatprep.mubr.msk.bf16.mxu0 %vm1878_vm1, %v1877_v28 }
 0x299   : > { %1669 = vmatprep.subr.bf16.mxu0 %v1877_v28 }
 0x29a   : > { %v913_v51 = vpop.permute.xlu1 %912 }
 0x29b   : > { %v918_v52 = vsel %vm579_vm2, %v913_v51, 0 }
 0x29e   : > { %v911_v53 = vpop.permute.xlu1 %910 }
 0x29f   : > { %1660 = vmatmul.mubr.msk.bf16.vlgmr.msra.gmra.mxu0 %vm579_vm2, %v800_v49 }
 0x2a0   : > { %1670 = vmatpush3.bf16.xpose.msra.mxu0 %v918_v52  ;;  %1671 = vmatprep.mubr.msk.bf16.mxu0 %vm1878_vm1, %v1877_v28 }
 0x2a1   : > { %1681 = vmatprep.subr.bf16.mxu0 %v1877_v28 }
 0x2a7   : > { %1672 = vmatmul.mubr.msk.bf16.vlgmr.msra.gmra.mxu0 %vm579_vm2, %v911_v53 }
 0x2a8   : > { %1689 = vmatprep.mubr.msk.bf16.mxu0 %vm1878_vm1, %v1877_v28 }
 0x353   : > { %v620_v54 = vpop.f32.mrf.mxu1 }
 0x354   : > { %v626_v55 = vmul.f32 0.25, %v620_v54 }
 0x355   : > { %v1637_v56 = vpop.f32.mrf.mxu1 }
 0x356   : > { %v628_v57 = vsel %vm627_vm4, %v626_v55, -inf }
 0x357   : > { %629 = vmax.xlane.f32.xlu1 %v628_v57  ;;  %v623_v58 = vpop.f32.mrf.mxu1  ;;  %v731_v59 = vpop.f32.mrf.mxu0 }
 0x358   : > { %v737_v60 = vmul.f32 0.25, %v731_v59 }
 0x359   : > { %v1638_v61 = vpop.f32.mrf.mxu1  ;;  %v1649_v62 = vpop.f32.mrf.mxu0 }
 0x35a   : > { %v738_v63 = vsel %vm627_vm4, %v737_v60, -inf  ;;  %v1754_v62 = vld [vmem:[%s2286_s5 + $0x18] sm:$0xff]  }
 0x35b   : > { %739 = vmax.xlane.f32.xlu0 %v738_v63  ;;  %v734_v1 = vpop.f32.mrf.mxu0  ;;  %1682 = vmatpush3.bf16.msra.mxu0 %v1754_v62  ;;  %v1773_v62 = vld [vmem:[%s2292_s11 + $0x30] sm:$0xff]  }
 0x35c   : > { %1683 = vmatprep.subr.bf16.mxu0 %v1877_v28 }
 0x35d   : > { %v1650_v2 = vpop.f32.mrf.mxu0 }
 0x35f   : > { %v843_v3 = vpop.f32.mrf.mxu0 }
 0x360   : > { %v849_v4 = vmul.f32 0.25, %v843_v3 }
 0x361   : > { %v1661_v5 = vpop.f32.mrf.mxu0 }
 0x362   : > { %v850_v6 = vsel %vm627_vm4, %v849_v4, -inf }
 0x363   : > { %851 = vmax.xlane.f32.xlu1 %v850_v6  ;;  %v846_v7 = vpop.f32.mrf.mxu0 }
 0x365   : > { %v1662_v8 = vpop.f32.mrf.mxu0 }
 0x366   : > { %v1756_v8 = vld [vmem:[%s2286_s5 + $0x8] sm:$0xff]  }
 0x367   : > { %v954_v9 = vpop.f32.mrf.mxu0 }
 0x368   : > { %v960_v10 = vmul.f32 0.25, %v954_v9  ;;  %v1757_v9 = vld [vmem:[%s2286_s5] sm:$0xff]  }
 0x369   : > { %v1673_v12 = vpop.f32.mrf.mxu0 }
 0x36a   : > { %v961_v13 = vsel %vm627_vm4, %v960_v10, -inf }
 0x36b   : > { %962 = vmax.xlane.f32.xlu0 %v961_v13  ;;  %v957_v14 = vpop.f32.mrf.mxu0 }
 0x36d   : > { %v1674_v15 = vpop.f32.mrf.mxu0 }
 0x3e0   : > { %v630_v16 = vpop.xlane.xlu1 %629 }
 0x3e1   : > { %v631_v17 = vsub.f32 %v626_v55, %v630_v16 }
 0x3e3   : > { %v632_v18 = vmul.f32 1.442695, %v631_v17 }
 0x3e4   : > { %v740_v19 = vpop.xlane.xlu0 %739 }
 0x3e5   : > { %1788 = vpow2.f32 %v632_v18  ;;  %v741_v20 = vsub.f32 %v737_v60, %v740_v19 }
 0x3e7   : > { %v742_v21 = vmul.f32 1.442695, %v741_v20 }
 0x3e9   : > { %1790 = vpow2.f32 %v742_v21 }
 0x3ec   : > { %v852_v34 = vpop.xlane.xlu1 %851 }
 0x3ed   : > { %v853_v35 = vsub.f32 %v849_v4, %v852_v34 }
 0x3ef   : > { %v854_v36 = vmul.f32 1.442695, %v853_v35 }
 0x3f2   : > { %v1789_v22 = vpop.eup %1788 }
 0x3f3   : > { %v634_v23 = vsel %vm627_vm4, %v1789_v22, 0.0 }
 0x3f4   : > { %v963_v24 = vpop.xlane.xlu0 %962  ;;  %635 = vadd.xlane.f32.xlu1 %v634_v23 }
 0x3f5   : > { %v964_v25 = vsub.f32 %v960_v10, %v963_v24 }
 0x3f6   : > { %v1791_v26 = vpop.eup %1790 }
 0x3f7   : > { %v965_v30 = vmul.f32 1.442695, %v964_v25  ;;  %v744_v31 = vsel %vm627_vm4, %v1791_v26, 0.0 }
 0x3f8   : > { %745 = vadd.xlane.f32.xlu0 %v744_v31 }
 0x3f9   : > { %1792 = vpow2.f32 %v965_v30 }
 0x3fa   : > { %1794 = vpow2.f32 %v854_v36 }
 0x405   : > { %751 = vrot.lane.b32.xlu1 %v2073_v44, %s1879_s23  ;;  %s429_s23 = sand.u32 1, %s1866_s26  }
 0x406   : > { %v1793_v32 = vpop.eup %1792  ;;  %s1453_s0 = scalar_lea.sflag [#allocation3], %s429_s23 }
 0x407   : > { %v967_v33 = vsel %vm627_vm4, %v1793_v32, 0.0  ;;  %v1795_v37 = vpop.eup %1794 }
 0x408   : > { %968 = vadd.xlane.f32.xlu0 %v967_v33  ;;  %v856_v39 = vsel %vm627_vm4, %v1795_v37, 0.0 }
 0x41e   : > { %862 = vrot.lane.b32.xlu0 %v2073_v44, %s1883_s16 }
 0x429   : > { %857 = vadd.xlane.f32.xlu1 %v856_v39 }
 0x43a   : > { %973 = vrot.lane.b32.xlu1 %v2073_v44, %s1885_s21 }
 0x47d   : > { %v636_v40 = vpop.xlane.xlu1 %635 }
 0x47e   : > { %1796 = vrcp.f32 %v636_v40 }
 0x481   : > { %v746_v41 = vpop.xlane.xlu0 %745  ;;  %v752_v45 = vpop.permute.xlu1 %751 }
 0x482   : > { %1798 = vrcp.f32 %v746_v41  ;;  %v757_v48 = vsel %vm643_vm3, %v752_v45, 0  ;;  %v1761_v45 = vld [vmem:[%s2290_s9 + $0x20] ss:$8 sps:$4 sm:$0xff]  }
 0x48b   : > { %v1797_v42 = vpop.eup %1796 }
 0x48c   : > { %v638_v43 = vmul.f32 %v1797_v42, %v1789_v22  ;;  %v1758_v42 = vld [vmem:[%s2290_s9 + $0x30] ss:$8 sps:$4 sm:$0xff]  }
 0x48e   : > { %v639_v46 = vpack.c.bf16 %v638_v43, %v638_v43  ;;  %v1763_v43 = vld [vmem:[%s2290_s9 + $0x24] ss:$8 sps:$4 sm:$0xff]  }
 0x48f   : > { %v1799_v47 = vpop.eup %1798 }
 0x490   : > { %1642 = vmatmul.mubr.msk.bf16.vlgmr.msra.gmra.mxu1 %vm627_vm4, %v639_v46  ;;  %v748_v44 = vmul.f32 %v1799_v47, %v1791_v26  ;;  %v1555_v26 = vld [vmem:[%s2287_s6] ss:$0 sm:$0xff]  ;;  %v1766_v46 = vld [vmem:[%s2290_s9 + $0x14] ss:$8 sps:$4 sm:$0xff]   ;;  %v1764_v47 = vld [vmem:[%s2290_s9 + $0x10] ss:$8 sps:$4 sm:$0xff]  }
 0x491   : > { %1652 = vmatpush3.bf16.msra.mxu1 %v757_v48  ;;  %v969_v49 = vpop.xlane.xlu0 %968  ;;  %1653 = vmatprep.mubr.msk.bf16.mxu1 %vm1878_vm1, %v1877_v28  ;;  %v1769_v48 = vld [vmem:[%s2290_s9 + $0x4] ss:$8 sps:$4 sm:$0xff]  }
 0x492   : > { %1663 = vmatprep.subr.bf16.mxu1 %v1877_v28  ;;  %v749_v52 = vpack.c.bf16 %v748_v44, %v748_v44 }
 0x495   : > { %v863_v50 = vpop.permute.xlu0 %862 }
 0x496   : > { %v868_v51 = vsel %vm643_vm3, %v863_v50, 0 }
 0x498   : > { %1654 = vmatmul.mubr.msk.bf16.vlgmr.msra.gmra.mxu1 %vm627_vm4, %v749_v52 }
 0x499   : > { %1664 = vmatpush3.bf16.msra.mxu1 %v868_v51  ;;  %1665 = vmatprep.mubr.msk.bf16.mxu1 %vm1878_vm1, %v1877_v28 }
 0x49a   : > { %1675 = vmatprep.subr.bf16.mxu1 %v1877_v28 }
 0x4b2   : > { %v858_v53 = vpop.xlane.xlu1 %857 }
 0x4b3   : > { %1800 = vrcp.f32 %v858_v53  ;;  %v1556_v53 = vld [vmem:[%s2288_s7] ss:$0 sm:$0xff] }
 0x4b4   : > { %1802 = vrcp.f32 %v969_v49  ;;  %v1767_v49 = vld [vmem:[%s2290_s9] ss:$8 sps:$4 sm:$0xff]  }
 0x4b6   : > { %v974_v56 = vpop.permute.xlu1 %973 }
 0x4b7   : > { %v979_v59 = vsel %vm643_vm3, %v974_v56, 0 }
 0x4c0   : > { %v1801_v54 = vpop.eup %1800 }
 0x4c1   : > { %v860_v55 = vmul.f32 %v1801_v54, %v1795_v37  ;;  %v1803_v58 = vpop.eup %1802 }
 0x4c2   : > { %v971_v60 = vmul.f32 %v1803_v58, %v1793_v32 }
 0x4c3   : > { %v861_v57 = vpack.c.bf16 %v860_v55, %v860_v55  ;;  %v1557_v55 = vld [vmem:[%s2289_s8] ss:$0 sm:$0xff] }
 0x4c4   : > { %v972_v61 = vpack.c.bf16 %v971_v60, %v971_v60  ;;  %v1771_v60 = vld [vmem:[%s2292_s11 + $0x38] sm:$0xff]  }
 0x4c5   : > { %1666 = vmatmul.mubr.msk.bf16.vlgmr.msra.gmra.mxu1 %vm627_vm4, %v861_v57 }
 0x4c6   : > { %1676 = vmatpush3.bf16.msra.mxu1 %v979_v59  ;;  %1677 = vmatprep.mubr.msk.bf16.mxu1 %vm1878_vm1, %v1877_v28  ;;  %v1770_v59 = vld [vmem:[%s2292_s11 + $0x78] sm:$0xff]  }
 0x4cd   : > { %1678 = vmatmul.mubr.msk.bf16.vlgmr.msra.gmra.mxu1 %vm627_vm4, %v972_v61  ;;  %v1772_v61 = vld [vmem:[%s2292_s11 + $0x70] sm:$0xff]  }
 0x4ce   : > { %1281 = vmatprep.mubr.bf16.mxu1 %v1876_v11  ;;  %v1755_v11 = vld [vmem:[%s2286_s5 + $0x10] sm:$0xff]  }
 0x4cf   : > { %1684 = vmatpush3.bf16.msra.mxu0 %v1755_v11  ;;  %v1782_v11 = vld [vmem:[%s2292_s11 + $0x48] sm:$0xff]  }
 0x4d0   : > { %1685 = vmatprep.subr.bf16.mxu0 %v1877_v28 }
 0x4d3   : > { %1686 = vmatpush3.bf16.msra.mxu0 %v1756_v8  ;;  %v1783_v8 = vld [vmem:[%s2292_s11 + $0x8] sm:$0xff]  }
 0x4d4   : > { %1687 = vmatprep.subr.bf16.mxu0 %v1877_v28 }
 0x4d7   : > { %1688 = vmatpush3.bf16.msra.mxu0 %v1757_v9  ;;  %v1784_v9 = vld [vmem:[%s2292_s11 + $0x40] sm:$0xff]  }
 0x4d8   : > { %1611 = vmatprep.subr.bf16.mxu0 %v1770_v59 }
 0x550   : > { %v681_v63 = vpop.f32.mrf.mxu1 }
 0x552   : > { %v1643_v1 = vpop.f32.mrf.mxu1 }
 0x553   : > { %v1775_v1 = vld [vmem:[%s2292_s11 + $0x28] sm:$0xff]  }
 0x554   : > { %v684_v2 = vpop.f32.mrf.mxu1 }
 0x555   : > { %v1776_v2 = vld [vmem:[%s2292_s11 + $0x60] sm:$0xff]  }
 0x556   : > { %v1644_v3 = vpop.f32.mrf.mxu1 }
 0x557   : > { %v1777_v3 = vld [vmem:[%s2292_s11 + $0x20] sm:$0xff]  }
 0x558   : > { %v793_v4 = vpop.f32.mrf.mxu1 }
 0x559   : > { %1022 = vrot.lane.b32.xlu1 %v793_v4, %s1884_s20  ;;  %s2306_s20 = smov 48   ;;  %v1778_v4 = vld [vmem:[%s2292_s11 + $0x58] sm:$0xff]  }
 0x55a   : > { %v1655_v5 = vpop.f32.mrf.mxu1 }
 0x55b   : > { %v1779_v5 = vld [vmem:[%s2292_s11 + $0x18] sm:$0xff]  }
 0x55c   : > { %v796_v6 = vpop.f32.mrf.mxu1 }
 0x55d   : > { %v1780_v6 = vld [vmem:[%s2292_s11 + $0x50] sm:$0xff]  }
 0x55e   : > { %v1656_v7 = vpop.f32.mrf.mxu1 }
 0x55f   : > { %v1781_v7 = vld [vmem:[%s2292_s11 + $0x10] sm:$0xff]  }
 0x585   : > { %v904_v10 = vpop.f32.mrf.mxu1 }
 0x586   : > { %1026 = vrot.lane.b32.xlu0 %v904_v10, %s1882_s15  ;;  %v1785_v10 = vld [vmem:[%s2292_s11] sm:$0xff]  }
 0x587   : > { %v1667_v12 = vpop.f32.mrf.mxu1 }
 0x588   : > { %v1133_v12 = vld [vmem:[%s2291_s10] sm:$0x3] }
 0x589   : > { %v907_v13 = vpop.f32.mrf.mxu1 }
 0x58a   : > { %v1199_v13 = vrot.slane %v1133_v12, %v482_v29 }
 0x58b   : > { %v1668_v14 = vpop.f32.mrf.mxu1 }
 0x58c   : > { %v1203_v14 = vrot.slane %v1133_v12, %v486_v38 }
 0x58d   : > { %v1015_v15 = vpop.f32.mrf.mxu1 }
 0x58e   : > { %1030 = vrot.lane.b32.xlu1 %v1015_v15, %s2306_s20  ;;  %s1529_s20 = sshll.u32 %s429_s23, 3 }
 0x58f   : > { %v1679_v16 = vpop.f32.mrf.mxu1  ;;  %s431_s15 = scalar_lea.vmem [#allocation2], %s1529_s20  ;;  %s1818_s20 = sshll.u32 %s1886_s29, 4  ;;  %s1819_s20 = int_to_ptr.vmem [resolvable:$false] %s1818_s20 }
 0x590   : > { %s1466_s24 = sshll.u32 %s431_s15, 4  ;;  %s1820_s2 = scalar_lea.vmem %s1819_s20, 256  ;;  %s1467_s24 = int_to_ptr.vmem [resolvable:$true] %s1466_s24 }
 0x591   : > { %v1018_v17 = vpop.f32.mrf.mxu1  ;;  %s1814_s1 = scalar_lea.vmem %s1467_s24, 128  ;;  %p1821_p0 = scmp.lt.s32.totalorder %s1467_s24, %s1819_s20 }
 0x592   : > { %p1815_p11 = scmp.ne.s32.totalorder %s1467_s24, %s1814_s1  ;;  %p1822_p1 = scmp.lt.s32.totalorder %s1820_s2, %s1814_s1 }
 0x593   : > { %v1680_v18 = vpop.f32.mrf.mxu1 }
 0x594   : > { %p1816_p12 = pnand %p1815_p11, %p1995_p5  ;;  %p1823_p2 = por %p1822_p1, %p1821_p0 }
 0x596   : > { %p1817_p13 = pneg %p1816_p12 }
 0x598   : > { %p1824_p3 = pnand %p1823_p2, %p1817_p13 }
 0x5cb   : > { %v1023_v19 = vpop.permute.xlu1 %1022 }
 0x5cc   : > { %v1033_v20 = vsel %vm579_vm2, %v681_v63, %v1023_v19  ;;  %v1774_v63 = vld [vmem:[%s2292_s11 + $0x68] sm:$0xff]  }
 0x5f8   : > { %v1027_v28 = vpop.permute.xlu0 %1026 }
 0x5f9   : > { %v1035_v21 = vsel %vm1034_vm5, %v1033_v20, %v1027_v28 }
 0x600   : > { %v1031_v22 = vpop.permute.xlu1 %1030 }
 0x601   : > { %v1037_v23 = vsel %vm1036_vm6, %v1035_v21, %v1031_v22 }
 0x602   : > { %v1038_v24 = vpack.c.bf16 %v1037_v23, %v1037_v23 }
 0x604   : > { %1690 = vmatmul.mubr.msk.bf16.vlgmr.msra.gmra.mxu0 %vm440_vm0, %v1038_v24 }
 0x605   : > { %1612 = vmatpush3.bf16.msra.mxu0 %v1771_v60 }
 0x606   : > { %1613 = vmatprep.subr.bf16.mxu0 %v1772_v61 }
 0x609   : > { %1614 = vmatpush3.bf16.msra.mxu0 %v1773_v62 }
 0x60a   : > { %1615 = vmatprep.subr.bf16.mxu0 %v1774_v63 }
 0x60d   : > { %1616 = vmatpush3.bf16.msra.mxu0 %v1775_v1 }
 0x60e   : > { %1617 = vmatprep.subr.bf16.mxu0 %v1776_v2 }
 0x611   : > { %1618 = vmatpush3.bf16.msra.mxu0 %v1777_v3 }
 0x612   : > { %1619 = vmatprep.subr.bf16.mxu0 %v1778_v4 }
 0x615   : > { %1620 = vmatpush3.bf16.msra.mxu0 %v1779_v5 }
 0x616   : > { %1621 = vmatprep.subr.bf16.mxu0 %v1780_v6 }
 0x619   : > { %1622 = vmatpush3.bf16.msra.mxu0 %v1781_v7 }
 0x61a   : > { %1623 = vmatprep.subr.bf16.mxu0 %v1782_v11 }
 0x61d   : > { %1624 = vmatpush3.bf16.msra.mxu0 %v1783_v8 }
 0x61e   : > { %1625 = vmatprep.subr.bf16.mxu0 %v1784_v9 }
 0x621   : > { %1626 = vmatpush3.bf16.msra.mxu0 %v1785_v10 }
 0x6c4   : > { %v1108_v25 = vpop.f32.mrf.mxu0 }
 0x6c5   : > { %v1114_v30 = vadd.f32 %v1108_v25, %v2010_v0  ;;  %v1760_v0 = vld [vmem:[%s2290_s9 + $0x34] ss:$8 sps:$4 sm:$0xff]  }
 0x6c6   : > { %v1691_v31 = vpop.f32.mrf.mxu0  ;;  %1257 = vmatprep.subr.bf16.mxu1 %v1760_v0 }
 0x6c7   : > { %v2150_v32 = vadd.f32 %v1555_v26, %v1114_v30  ;;  %1258 = vmatpush1.bf16.msra.mxu1 %v1758_v42 }
 0x6c8   : > { %v1111_v33 = vpop.f32.mrf.mxu0  ;;  %1259 = vmatprep.subr.bf16.mxu1 %v1763_v43 }
 0x6c9   : > { %v1167_v34 = vsel %vm440_vm0, %v2150_v32, 0.0 }
 0x6ca   : > { %1168 = vadd.xlane.f32.xlu0 %v1167_v34  ;;  %v1692_v35 = vpop.f32.mrf.mxu0 }
 0x6cb   : > { %1260 = vmatpush1.bf16.msra.mxu1 %v1761_v45 }
 0x6cc   : > { %1261 = vmatprep.subr.bf16.mxu1 %v1766_v46 }
 0x6cf   : > { %1262 = vmatpush1.bf16.msra.mxu1 %v1764_v47 }
 0x6d0   : > { %1263 = vmatprep.subr.bf16.mxu1 %v1769_v48 }
 0x6d3   : > { %1264 = vmatpush1.bf16.msra.mxu1 %v1767_v49 }
 0x753   : > { %v1169_v36 = vpop.xlane.xlu0 %1168 }
 0x754   : > { %v1170_v37 = vmul.f32 0.015625, %v1169_v36  ;;  %v1569_v36 = vld [vmem:[%s2293_s12] ss:$0 sm:$0xff] }
 0x756   : > { %v1171_v39 = vsub.f32 %v2150_v32, %v1170_v37 }
 0x758   : > { %v1172_v40 = vmul.f32 %v1171_v39, %v1171_v39 }
 0x75a   : > { %v1173_v41 = vsel %vm440_vm0, %v1172_v40, 0.0 }
 0x75b   : > { %1174 = vadd.xlane.f32.xlu1 %v1173_v41 }
 0x7e4   : > { %v1175_v44 = vpop.xlane.xlu1 %1174 }
 0x7e5   : > { %v1176_v50 = vmul.f32 0.015625, %v1175_v44 }
 0x7e7   : > { %v1177_v51 = vadd.f32 1e-05, %v1176_v50 }
 0x7e9   : > { %1804 = vrsqrt.f32 %v1177_v51 }
 0x7f6   : > { %v1805_v52 = vpop.eup %1804 }
 0x7f7   : > { %v1179_v54 = vmul.f32 %v1805_v52, %v1171_v39 }
 0x7f9   : > { %v1186_v56 = vmul.f32 %v1556_v53, %v1179_v54 }
 0x7fb   : > { %v1193_v57 = vadd.f32 %v1557_v55, %v1186_v56 }
 0x7fd   : > { %v1194_v58 = vpack.c.bf16 %v1193_v57, %v1193_v57 }
 0x7ff   : > { %1566 = vmatmul.mubr.msk.bf16.vlgmr.msra.gmra.mxu1 %vm440_vm0, %v1194_v58 }
 0x8bf   : > { %v1283_v15 = vpop.f32.mrf.mxu1 }
 0x8c0   : > { %v1284_v16 = vadd.f32 %v1283_v15, %v1199_v13 }
 0x8c1   : > { %v1285_v17 = vpop.f32.mrf.mxu1 }
 0x8c2   : > { %v1567_v18 = vmul.f32 -1.702, %v1284_v16  ;;  %v1286_v19 = vadd.f32 %v1285_v17, %v1203_v14 }
 0x8c3   : > { %v1287_v28 = vpop.f32.mrf.mxu1 }
 0x8c4   : > { %v1294_v20 = vmul.f32 1.442695, %v1567_v18  ;;  %v1568_v21 = vmul.f32 -1.702, %v1286_v19 }
 0x8c5   : > { %v1288_v22 = vpop.f32.mrf.mxu1 }
 0x8c6   : > { %1806 = vpow2.f32 %v1294_v20  ;;  %v1296_v23 = vmul.f32 1.442695, %v1568_v21 }
 0x8c8   : > { %1808 = vpow2.f32 %v1296_v23 }
 0x8d3   : > { %v1807_v24 = vpop.eup %1806 }
 0x8d4   : > { %v1298_v25 = vadd.f32 1.0, %v1807_v24 }
 0x8d5   : > { %v1809_v26 = vpop.eup %1808 }
 0x8d6   : > { %1810 = vrcp.f32 %v1298_v25  ;;  %v1299_v29 = vadd.f32 1.0, %v1809_v26 }
 0x8d8   : > { %1812 = vrcp.f32 %v1299_v29 }
 0x8e3   : > { %v1811_v27 = vpop.eup %1810 }
 0x8e4   : > { %v1304_v30 = vmul.f32 %v1811_v27, %v1284_v16 }
 0x8e5   : > { %v1813_v38 = vpop.eup %1812 }
 0x8e6   : > { %v1305_v31 = vmul.f32 %v1813_v38, %v1286_v19  ;;  %v1306_v34 = vpack.c.bf16 %v1304_v30, %v1304_v30 }
 0x8e8   : > { %v1307_v33 = vpack.c.bf16 %v1305_v31, %v1305_v31 }
 0x8ea   : > { %1442 = vmatprep.mubr.bf16.mxu0 %v1307_v33 }
 0x8eb   : > { %1443 = vmatmul.mubr.bf16.vlgmr.msra.gmra.mxu0 %v1306_v34 }
 0x9ab   : > { %v1627_v35 = vpop.f32.mrf.mxu0 }
 0x9ad   : > { %v1628_v37 = vpop.f32.mrf.mxu0 }
 0x9ae   : > { %v1629_v39 = vadd.f32 %v1628_v37, %v1627_v35 }
 0x9af   : > { %v1630_v40 = vpop.f32.mrf.mxu0 }
 0x9b0   : > { %v1445_v41 = vadd.f32 %v1629_v39, %v1569_v36 }
 0x9b1   : > { %v1631_v0 = vpop.f32.mrf.mxu0 }
 0x9b2   : > { %v1450_v42 = vadd.f32 %v1445_v41, %v2150_v32 }
 0x9b4   : > { %1451 = vst.msk [vmem:[%s431_s15] sm:$0xff] %vm440_vm0, %v1450_v42 }
 0x9b5   : > { %1827 = shalt.err (!%p1824_p3)
}
 0x9b6   : > { %s1828_s16 = scalar_lea.hbm %s1464_s22, 128  ;;  %s1832_s15 = scalar_lea.hbm %s2294_s13, 256 }
 0x9b7   : > { %p1829_p4 = scmp.ne.s32.totalorder %s1464_s22, %s1828_s16  ;;  %p1833_p9 = scmp.lt.s32.totalorder %s1464_s22, %s2294_s13 }
 0x9b8   : > { %p1834_p10 = scmp.lt.s32.totalorder %s1832_s15, %s1828_s16 }
 0x9b9   : > { %p1830_p7 = pnand %p1829_p4, %p1995_p5 }
 0x9ba   : > { %p1835_p11 = por %p1834_p10, %p1833_p9 }
 0x9bb   : > { %p1831_p8 = pneg %p1830_p7 }
 0x9bd   : > { %p1836_p12 = pnand %p1835_p11, %p1831_p8 }
 0x9bf   : > { %1839 = shalt.err (!%p1836_p12)
}
 0x9c0   : > { %1693 = dma.vmem_to_hbm [thread:$0]  (%p1995_p5), %s1467_s24, 128, %s1464_s22, %s1453_s0  }
 0x9c1 PF: > { %p1699_p13 = scmp.ge.s32.totalorder %s1874_s28, 2  ;;  %s1478_s2 = sand.u32 1, %s1862_s25  }
 0x9c2   : > { %s1479_s1 = scalar_lea.sflag [#allocation3], %s1478_s2 }
 0x9c3   : > { %p1696_p0 = pnand %p1699_p13, %p1999_p6 }
 0x9c5   : > { %p1697_p1 = pneg %p1696_p0 }
 0x9c7   : > { %1857 = dma.done.wait (%p1697_p1), %s1479_s1, 128  }
 0x9c8   : > { %1859 = vsyncadd (%p1697_p1), %s1479_s1, 4294967168  ;;  %p23_p2 = scmp.ge.s32.totalorder %s1982_s14, 4   ;;  %s2307_s25 = smov %s1866_s26 }
 0x9c9   : > { %s2308_s26 = smov %s1870_s27  ;;  %s2309_s27 = smov %s1993_s17 }
 0x9ca   : > { %s2310_s28 = smov %s1982_s14  ;;  %25 = sbr.rel (!%p23_p2) target bundleno = 8 (0x8), region = 107 }
 0x9cf   :  { %1484 = vsyncpa [#allocation3], 1 }
 0x9d0   :  { %1486 = vsyncpa [#allocation3 + $0x1], 1 }

</bundles_post_ra>
